<compile_context>
chip_gen: v7x
topology: tpu7x:2x2x1
jax: 0.10.0
libtpu: 0.0.40
codegen_flags: <defaults>
</compile_context>

<pallas_src>
import jax
import jax.numpy as jnp
from jax.experimental import pallas as pl
from jax.experimental.pallas import tpu as pltpu


# ---------------------------------------------------------------------------
# Helpers
# ---------------------------------------------------------------------------
def _pick_tile_rows(M: int, N: int, itemsize: int,
                    target_block_bytes: int = 2 * 1024 * 1024) -> int:
    """Pick a row-tile size giving ~target_block_bytes per block.

    The returned value is either a multiple of 8 (< M) or exactly M (full dim),
    both of which satisfy the TPU (8, 128) block-shape constraint (the last dim
    of every block is the full feature dim N).
    """
    bytes_per_row = max(1, N * itemsize)
    rows = max(1, target_block_bytes // bytes_per_row)
    if rows >= M:
        return M                      # whole array in one block (full-dim block)
    rows = max(8, (rows // 8) * 8)    # multiple of 8
    return min(rows, M)               # if this hits M it is the full dim -> legal


def _as_2d(x: jax.Array):
    """Flatten to (rows, features) keeping the last axis on the lane dim."""
    if x.ndim == 1:
        return x.reshape(1, x.shape[0]), x.shape
    if x.ndim == 2:
        return x, x.shape
    return x.reshape(-1, x.shape[-1]), x.shape


# ---------------------------------------------------------------------------
# Kernel 1: global min / max reduction  (+ precomputed 1/(max-min))
#   - vector accumulators in VMEM scratch, single finalize reduce
#   - partial last block masked by row index
# ---------------------------------------------------------------------------
def _make_minmax_kernel(M: int, tile_rows: int, needs_mask: bool):
    def kernel(x_ref, min_ref, max_ref, inv_ref, min_acc, max_acc):
        i = pl.program_id(0)

        @pl.when(i == 0)
        def _init():
            min_acc[...] = jnp.full_like(min_acc, jnp.inf)
            max_acc[...] = jnp.full_like(max_acc, -jnp.inf)

        t = x_ref[...]
        if needs_mask:
            # Rows past the end of the array are padding with unspecified
            # contents; replace them with +/- inf so they never win.
            rows_left = M - i * tile_rows
            row_idx = jax.lax.broadcasted_iota(jnp.int32, t.shape, 0)
            valid = row_idx < rows_left
            t_min = jnp.where(valid, t, jnp.array(jnp.inf, t.dtype))
            t_max = jnp.where(valid, t, jnp.array(-jnp.inf, t.dtype))
        else:
            t_min = t
            t_max = t

        # Pure VPU elementwise accumulation per step (no cross-lane reduce here).
        min_acc[...] = jnp.minimum(min_acc[...], t_min)
        max_acc[...] = jnp.maximum(max_acc[...], t_max)

        @pl.when(i == pl.num_programs(0) - 1)
        def _finalize():
            mn = jnp.min(min_acc[...], keepdims=True).astype(jnp.float32)  # (1,1)
            mx = jnp.max(max_acc[...], keepdims=True).astype(jnp.float32)  # (1,1)
            min_ref[...] = mn
            max_ref[...] = mx
            # (x - mn) * (1/(mx-mn)) reproduces PyTorch's nan/inf behavior when
            # mx == mn, so no extra guard is added.
            inv_ref[...] = 1.0 / (mx - mn)

    return kernel


def global_min_max_inv(x: jax.Array, *, target_block_bytes: int = 2 * 1024 * 1024):
    """Return ((1,1) min, (1,1) max, (1,1) 1/(max-min)) as float32 arrays."""
    x2d, _ = _as_2d(x)
    M, N = x2d.shape
    tile_rows = _pick_tile_rows(M, N, x2d.dtype.itemsize, target_block_bytes)
    n_blocks = pl.cdiv(M, tile_rows)
    needs_mask = (M % tile_rows) != 0
    kernel = _make_minmax_kernel(M, tile_rows, needs_mask)

    mn, mx, inv = pl.pallas_call(
        kernel,
        out_shape=(
            jax.ShapeDtypeStruct((1, 1), jnp.float32),
            jax.ShapeDtypeStruct((1, 1), jnp.float32),
            jax.ShapeDtypeStruct((1, 1), jnp.float32),
        ),
        grid_spec=pltpu.PrefetchScalarGridSpec(
            num_scalar_prefetch=0,
            grid=(n_blocks,),
            in_specs=[pl.BlockSpec((tile_rows, N), lambda i: (i, 0))],
            out_specs=(
                pl.BlockSpec((1, 1), lambda i: (0, 0)),
                pl.BlockSpec((1, 1), lambda i: (0, 0)),
                pl.BlockSpec((1, 1), lambda i: (0, 0)),
            ),
            scratch_shapes=[
                pltpu.VMEM((tile_rows, N), x2d.dtype),   # running min
                pltpu.VMEM((tile_rows, N), x2d.dtype),   # running max
            ],
        ),
        compiler_params=pltpu.CompilerParams(
            dimension_semantics=("arbitrary",),          # sequential reduction axis
        ),
    )(x2d)
    return mn, mx, inv


# ---------------------------------------------------------------------------
# Kernel 2: elementwise rescale  (x - min) * inv_scale
#   - min / inv_scale arrive via SMEM (scalar path), no per-step divide
# ---------------------------------------------------------------------------
def _scale_kernel(mn_ref, inv_ref, x_ref, o_ref):
    mn = mn_ref[0, 0]
    inv = inv_ref[0, 0]
    o_ref[...] = ((x_ref[...].astype(jnp.float32) - mn) * inv).astype(o_ref.dtype)


def min_max_scale(x: jax.Array, mn: jax.Array, inv: jax.Array,
                  *, target_block_bytes: int = 2 * 1024 * 1024):
    x2d, orig_shape = _as_2d(x)
    M, N = x2d.shape
    tile_rows = _pick_tile_rows(M, N, x2d.dtype.itemsize, target_block_bytes)
    n_blocks = pl.cdiv(M, tile_rows)

    out = pl.pallas_call(
        _scale_kernel,
        out_shape=jax.ShapeDtypeStruct((M, N), x2d.dtype),
        grid_spec=pltpu.PrefetchScalarGridSpec(
            num_scalar_prefetch=0,
            grid=(n_blocks,),
            in_specs=[
                pl.BlockSpec(memory_space=pltpu.MemorySpace.SMEM),   # min
                pl.BlockSpec(memory_space=pltpu.MemorySpace.SMEM),   # 1/(max-min)
                pl.BlockSpec((tile_rows, N), lambda i: (i, 0)),
            ],
            out_specs=pl.BlockSpec((tile_rows, N), lambda i: (i, 0)),
        ),
        compiler_params=pltpu.CompilerParams(
            dimension_semantics=("parallel",),           # megacore-friendly
        ),
    )(mn, inv, x2d)
    return out.reshape(orig_shape)


# ---------------------------------------------------------------------------
# Module-equivalent wrapper (dict-of-modalities plumbing stays in plain Python)
# ---------------------------------------------------------------------------
class MinMaxScalerPallas:
    """Transforms each modality's inputs so that values lie in [0, 1]."""

    def __init__(self):
        self.is_fitted = False
        self.mins = {}
        self.maxs = {}
        self.invs = {}   # precomputed 1/(max-min), derived state for the scale kernel

    def fit(self, embeddings):
        self.mins, self.maxs, self.invs = {}, {}, {}
        for m, x in embeddings.items():
            mn, mx, inv = global_min_max_inv(x)
            self.mins[m] = mn
            self.maxs[m] = mx
            self.invs[m] = inv
        self.is_fitted = True

    def forward(self, embeddings):
        return {
            m: min_max_scale(x, self.mins[m], self.invs[m])
            for m, x in embeddings.items()
        }

    def forward_modality(self, modality_embedding, modality):
        return min_max_scale(
            modality_embedding, self.mins[modality], self.invs[modality]
        )


if __name__ == "__main__":
    key = jax.random.PRNGKey(0)
    k0, k1, k2 = jax.random.split(key, 3)

    # Two modalities with small embedding shapes (batch, features).
    embeddings = {
        "image": jax.random.normal(k0, (8, 128), dtype=jnp.float32) * 3.0 + 1.0,
        "text": jax.random.normal(k1, (16, 256), dtype=jnp.float32) * 0.5 - 2.0,
    }

    scaler = MinMaxScalerPallas()
    scaler.fit(embeddings)
    out = scaler.forward(embeddings)
    out = jax.tree_util.tree_map(jax.block_until_ready, out)

    # Sanity check against the pure-JAX reference of the PyTorch semantics.
    for m, x in embeddings.items():
        ref = (x - jnp.min(x)) / (jnp.max(x) - jnp.min(x))
        assert out[m].shape == x.shape and out[m].dtype == x.dtype
        assert jnp.allclose(out[m], ref, atol=1e-5, rtol=1e-5), m

    # forward_modality path.
    ym = scaler.forward_modality(embeddings["image"], "image")
    ref = (embeddings["image"] - jnp.min(embeddings["image"])) / (
        jnp.max(embeddings["image"]) - jnp.min(embeddings["image"])
    )
    assert jnp.allclose(jax.block_until_ready(ym), ref, atol=1e-5, rtol=1e-5)

    # Exercise the multi-block + partial-last-tile masking path with a tiny
    # block budget (50 rows, tile_rows=8 -> 7 blocks, last block has 2 valid rows).
    x = jax.random.normal(k2, (50, 256), dtype=jnp.float32) * 2.0 + 0.3
    small = 8 * 256 * 4
    mn, mx, inv = global_min_max_inv(x, target_block_bytes=small)
    y = jax.block_until_ready(min_max_scale(x, mn, inv, target_block_bytes=small))
    assert jnp.allclose(mn[0, 0], jnp.min(x), atol=1e-6)
    assert jnp.allclose(mx[0, 0], jnp.max(x), atol=1e-6)
    ref = (x - jnp.min(x)) / (jnp.max(x) - jnp.min(x))
    assert jnp.allclose(y, ref, atol=1e-5, rtol=1e-5)

    print("KERNEL_OK")
</pallas_src>

<mosaic_0001>
module attributes {stable_mosaic.version = 11 : i64} {
  func.func @kernel(%arg0: i32, %arg1: memref<8x128xf32, #tpu.memory_space<vmem>>, %arg2: memref<1x1xf32, #tpu.memory_space<vmem>>, %arg3: memref<1x1xf32, #tpu.memory_space<vmem>>, %arg4: memref<1x1xf32, #tpu.memory_space<vmem>>, %arg5: memref<8x128xf32, #tpu.memory_space<vmem>>, %arg6: memref<8x128xf32, #tpu.memory_space<vmem>>) attributes {dimension_semantics = [#tpu.dimension_semantics<arbitrary>], iteration_bounds = array<i64: 1>, scalar_prefetch = 0 : i64, scratch_operands = 2 : i64, tpu.core_type = #tpu.core_type<tc>, window_params = [{transform_indices = @transform_0, window_bounds = array<i64: 8, 128>}, {pipeline_mode = #tpu.pipeline_mode<synchronous>, transform_indices = @transform_1, window_bounds = array<i64: 1, 1>}, {pipeline_mode = #tpu.pipeline_mode<synchronous>, transform_indices = @transform_2, window_bounds = array<i64: 1, 1>}, {pipeline_mode = #tpu.pipeline_mode<synchronous>, transform_indices = @transform_3, window_bounds = array<i64: 1, 1>}]} {
    %c0_i32 = arith.constant 0 : i32
    %0 = arith.cmpi eq, %arg0, %c0_i32 : i32
    %1 = arith.extui %0 : i1 to i32
    %c0_i32_0 = arith.constant 0 : i32
    %2 = arith.cmpi ne, %1, %c0_i32_0 : i32
    scf.if %2 {
      %cst = arith.constant 0x7F800000 : f32
      %13 = vector.broadcast %cst : f32 to vector<8x128xf32>
      %c0_12 = arith.constant 0 : index
      %c0_13 = arith.constant 0 : index
      %14 = vector.load %arg5[%c0_12, %c0_13] : memref<8x128xf32, #tpu.memory_space<vmem>>, vector<8x128xf32>
      tpu.vector_store %arg5[%c0_12, %c0_13], %13 {strides = array<i32>} : memref<8x128xf32, #tpu.memory_space<vmem>>, vector<8x128xf32>,
      %cst_14 = arith.constant 0xFF800000 : f32
      %15 = vector.broadcast %cst_14 : f32 to vector<8x128xf32>
      %c0_15 = arith.constant 0 : index
      %c0_16 = arith.constant 0 : index
      %16 = vector.load %arg6[%c0_15, %c0_16] : memref<8x128xf32, #tpu.memory_space<vmem>>, vector<8x128xf32>
      tpu.vector_store %arg6[%c0_15, %c0_16], %15 {strides = array<i32>} : memref<8x128xf32, #tpu.memory_space<vmem>>, vector<8x128xf32>,
    } else {
    }
    %c0 = arith.constant 0 : index
    %c0_1 = arith.constant 0 : index
    %3 = vector.load %arg1[%c0, %c0_1] : memref<8x128xf32, #tpu.memory_space<vmem>>, vector<8x128xf32>
    %c0_2 = arith.constant 0 : index
    %c0_3 = arith.constant 0 : index
    %4 = vector.load %arg5[%c0_2, %c0_3] : memref<8x128xf32, #tpu.memory_space<vmem>>, vector<8x128xf32>
    %5 = arith.minimumf %4, %3 : vector<8x128xf32>
    %c0_4 = arith.constant 0 : index
    %c0_5 = arith.constant 0 : index
    %6 = vector.load %arg5[%c0_4, %c0_5] : memref<8x128xf32, #tpu.memory_space<vmem>>, vector<8x128xf32>
    tpu.vector_store %arg5[%c0_4, %c0_5], %5 {strides = array<i32>} : memref<8x128xf32, #tpu.memory_space<vmem>>, vector<8x128xf32>,
    %c0_6 = arith.constant 0 : index
    %c0_7 = arith.constant 0 : index
    %7 = vector.load %arg6[%c0_6, %c0_7] : memref<8x128xf32, #tpu.memory_space<vmem>>, vector<8x128xf32>
    %8 = arith.maximumf %7, %3 : vector<8x128xf32>
    %c0_8 = arith.constant 0 : index
    %c0_9 = arith.constant 0 : index
    %9 = vector.load %arg6[%c0_8, %c0_9] : memref<8x128xf32, #tpu.memory_space<vmem>>, vector<8x128xf32>
    tpu.vector_store %arg6[%c0_8, %c0_9], %8 {strides = array<i32>} : memref<8x128xf32, #tpu.memory_space<vmem>>, vector<8x128xf32>,
    %c0_i32_10 = arith.constant 0 : i32
    %10 = arith.cmpi eq, %arg0, %c0_i32_10 : i32
    %11 = arith.extui %10 : i1 to i32
    %c0_i32_11 = arith.constant 0 : i32
    %12 = arith.cmpi ne, %11, %c0_i32_11 : i32
    scf.if %12 {
      %c0_12 = arith.constant 0 : index
      %c0_13 = arith.constant 0 : index
      %13 = vector.load %arg5[%c0_12, %c0_13] : memref<8x128xf32, #tpu.memory_space<vmem>>, vector<8x128xf32>
      %14 = vector.shape_cast %13 : vector<8x128xf32> to vector<1x8x128xf32>
      %cst = arith.constant dense<0x7F800000> : vector<1xf32>
      %15 = vector.multi_reduction <minimumf>, %14, %cst [1, 2] : vector<1x8x128xf32> to vector<1xf32>
      %16 = vector.shape_cast %15 : vector<1xf32> to vector<1x1x1xf32>
      %17 = vector.extract %16[0, 0, 0] : f32 from vector<1x1x1xf32>
      %18 = vector.broadcast %17 : f32 to vector<1x1xf32>
      %c0_14 = arith.constant 0 : index
      %c0_15 = arith.constant 0 : index
      %19 = vector.load %arg6[%c0_14, %c0_15] : memref<8x128xf32, #tpu.memory_space<vmem>>, vector<8x128xf32>
      %20 = vector.shape_cast %19 : vector<8x128xf32> to vector<1x8x128xf32>
      %cst_16 = arith.constant dense<0xFF800000> : vector<1xf32>
      %21 = vector.multi_reduction <maximumf>, %20, %cst_16 [1, 2] : vector<1x8x128xf32> to vector<1xf32>
      %22 = vector.shape_cast %21 : vector<1xf32> to vector<1x1x1xf32>
      %23 = vector.extract %22[0, 0, 0] : f32 from vector<1x1x1xf32>
      %24 = vector.broadcast %23 : f32 to vector<1x1xf32>
      %c0_17 = arith.constant 0 : index
      %c0_18 = arith.constant 0 : index
      %25 = vector.load %arg2[%c0_17, %c0_18] : memref<1x1xf32, #tpu.memory_space<vmem>>, vector<1x1xf32>
      tpu.vector_store %arg2[%c0_17, %c0_18], %18 {strides = array<i32>} : memref<1x1xf32, #tpu.memory_space<vmem>>, vector<1x1xf32>,
      %c0_19 = arith.constant 0 : index
      %c0_20 = arith.constant 0 : index
      %26 = vector.load %arg3[%c0_19, %c0_20] : memref<1x1xf32, #tpu.memory_space<vmem>>, vector<1x1xf32>
      tpu.vector_store %arg3[%c0_19, %c0_20], %24 {strides = array<i32>} : memref<1x1xf32, #tpu.memory_space<vmem>>, vector<1x1xf32>,
      %27 = arith.subf %24, %18 : vector<1x1xf32>
      %cst_21 = arith.constant 1.000000e+00 : f32
      %28 = vector.broadcast %cst_21 : f32 to vector<1x1xf32>
      %29 = arith.divf %28, %27 : vector<1x1xf32>
      %c0_22 = arith.constant 0 : index
      %c0_23 = arith.constant 0 : index
      %30 = vector.load %arg4[%c0_22, %c0_23] : memref<1x1xf32, #tpu.memory_space<vmem>>, vector<1x1xf32>
      tpu.vector_store %arg4[%c0_22, %c0_23], %29 {strides = array<i32>} : memref<1x1xf32, #tpu.memory_space<vmem>>, vector<1x1xf32>,
    } else {
    }
    return
  }
  func.func @transform_0(%arg0: i32) -> (i32, i32) {
    %c0_i32 = arith.constant 0 : i32
    %c0_i32_0 = arith.constant 0 : i32
    return %arg0, %c0_i32 : i32, i32
  }
  func.func @transform_1(%arg0: i32) -> (i32, i32) {
    %c0_i32 = arith.constant 0 : i32
    %c0_i32_0 = arith.constant 0 : i32
    %c0_i32_1 = arith.constant 0 : i32
    return %c0_i32, %c0_i32_0 : i32, i32
  }
  func.func @transform_2(%arg0: i32) -> (i32, i32) {
    %c0_i32 = arith.constant 0 : i32
    %c0_i32_0 = arith.constant 0 : i32
    %c0_i32_1 = arith.constant 0 : i32
    return %c0_i32, %c0_i32_0 : i32, i32
  }
  func.func @transform_3(%arg0: i32) -> (i32, i32) {
    %c0_i32 = arith.constant 0 : i32
    %c0_i32_0 = arith.constant 0 : i32
    %c0_i32_1 = arith.constant 0 : i32
    return %c0_i32, %c0_i32_0 : i32, i32
  }
}

</mosaic_0001>

<bundles_post_ra>
// kernel: tpu_custom_call.1
= control target key start
LH: loop header
LB: loop body
LE: loop exit
PB: predicated region body
PF: predicated region fallthrough
CT: control target
= control target key end

     0   :  { %9 = vsyncpa [#allocation5], 0  ;;  %s291_s0 = inlined_call_operand.hbm [shape: f32[8,128], index: 0, kind: input, shape index: {}]   ;;  %s292_s1 = inlined_call_operand.hbm [shape: f32[1,1], index: 1, kind: output, shape index: {0}]   ;;  %s293_s2 = inlined_call_operand.hbm [shape: f32[1,1], index: 2, kind: output, shape index: {1}]   ;;  %s294_s3 = inlined_call_operand.hbm [shape: f32[1,1], index: 3, kind: output, shape index: {2}]  }
   0x1   :  { %10 = vsyncpa [#allocation6], 0 }
   0x2   :  { %11 = vsyncpa [#allocation9], 0  ;;  %s216_s12 = smov [#allocation4]   ;;  %s122_s16 = scalar_lea.hbm %s291_s0, 128 }
   0x3   :  { %s18_s13 = sshll.u32 %s216_s12, 4  ;;  %p123_p0 = scmp.ne.s32.totalorder %s291_s0, %s122_s16  ;;  %s19_s13 = int_to_ptr.vmem [resolvable:$true] %s18_s13 }
   0x4   :  { %p126_p1 = scmp.lt.u32.totalorder %s122_s16, %s291_s0 }
   0x6   :  { %p128_p2 = pnand %p126_p1, %p123_p0 }
   0x8   :  { %131 = shalt.err (!%p128_p2)
}
   0x9   :  { %s132_s21 = scalar_lea.vmem %s19_s13, 128  ;;  %p137_p4 = scmp.lt.s32.totalorder %s19_s13, %s19_s13 }
   0xa   :  { %p133_p3 = scmp.ne.s32.totalorder %s19_s13, %s132_s21  ;;  %p138_p5 = scmp.lt.s32.totalorder %s132_s21, %s132_s21 }
   0xc   :  { %p139_p6 = por %p138_p5, %p137_p4 }
   0xe   :  { %p140_p7 = pnand %p139_p6, %p133_p3 }
  0x10   :  { %143 = shalt.err (!%p140_p7)
}
  0x11   :  { %21 = dma.hbm_to_vmem [thread:$0]  %s291_s0, 128, %s19_s13, [#allocation5]  }
  0x12   :  { %210 = dma.done.wait [#allocation5], 128  }
  0x13   :  { %211 = vsyncadd [#allocation5], 4294967168  ;;  %v31_v0 = vld [vmem:[#allocation4] sm:$0xff]  ;;  %s217_s0 = smov [#allocation7]   ;;  %vm63_vm0 = vcmask 0   ;;  %s218_s26 = smov [#allocation8]  }
  0x14   :  { %42 = vmin.xlane.f32.xlu0 %v31_v0  ;;  %s76_s24 = sshll.u32 %s217_s0, 4  ;;  %s86_s27 = sshll.u32 %s218_s26, 4  ;;  %s77_s24 = int_to_ptr.vmem [resolvable:$true] %s76_s24  ;;  %s87_s27 = int_to_ptr.vmem [resolvable:$true] %s86_s27 }
  0x15   :  { %s144_s28 = scalar_lea.vmem %s77_s24, 16  ;;  %s148_s29 = scalar_lea.vmem %s77_s24, 32 }
  0x16   :  { %p145_p8 = scmp.ne.s32.totalorder %s77_s24, %s144_s28  ;;  %p149_p9 = scmp.lt.s32.totalorder %s77_s24, %s77_s24 }
  0x17   :  { %p150_p10 = scmp.lt.s32.totalorder %s148_s29, %s144_s28 }
  0x18   :  { %53 = vmax.xlane.f32.xlu0 %v31_v0 }
  0x19   :  { %p151_p11 = por %p150_p10, %p149_p9 }
  0x1b   :  { %p152_p12 = pnand %p151_p11, %p145_p8 }
  0xa1   :  { %v43_v1 = vpop.xlane.xlu0 %42 }
  0xa2   :  { %v44_v2 = vrot.slane %v43_v1, 4 }
  0xa4   :  { %v45_v3 = vmin.f32 %v43_v1, %v44_v2 }
  0xa5   :  { %v54_v4 = vpop.xlane.xlu0 %53 }
  0xa6   :  { %v46_v5 = vrot.slane %v45_v3, 2  ;;  %v55_v6 = vrot.slane %v54_v4, 4 }
  0xa8   :  { %v56_v7 = vmax.f32 %v54_v4, %v55_v6  ;;  %v47_v8 = vmin.f32 %v45_v3, %v46_v5 }
  0xaa   :  { %v57_v9 = vrot.slane %v56_v7, 2  ;;  %v48_v10 = vrot.slane %v47_v8, 1 }
  0xac   :  { %v58_v11 = vmax.f32 %v56_v7, %v57_v9  ;;  %v49_v12 = vmin.f32 %v47_v8, %v48_v10 }
  0xae   :  { %112 = vpush %v49_v12  ;;  %v59_v13 = vrot.slane %v58_v11, 1 }
  0xb0   :  { %v60_v14 = vmax.f32 %v58_v11, %v59_v13 }
  0xb2   :  { %114 = vpush %v60_v14 }
  0xdf   :  { %s113_s25 = spop %112 }
  0xe0   :  { %v51_v15 = vstv %s113_s25 }
  0xe1   :  { %64 = vst.msk [vmem:[#allocation7] sm:$0x1] %vm63_vm0, %v51_v15 }
  0xe2   :  { %155 = shalt.err (!%p152_p12)
}
  0xe3   :  { %s156_s5 = scalar_lea.hbm %s292_s1, 16 }
  0xe4   :  { %p157_p13 = scmp.ne.s32.totalorder %s292_s1, %s156_s5  ;;  %p160_p0 = scmp.lt.u32.totalorder %s156_s5, %s292_s1 }
  0xe6   :  { %p162_p1 = pnand %p160_p0, %p157_p13 }
  0xe8   :  { %165 = shalt.err (!%p162_p1)
}
  0xe9   :  { %79 = dma.vmem_to_hbm [thread:$0]  %s77_s24, 16, %s292_s1, [#allocation6]  }
  0xea   :  { %s115_s12 = spop %114  ;;  %s166_s13 = scalar_lea.vmem %s87_s27, 16 }
  0xeb   :  { %v62_v16 = vstv %s115_s12  ;;  %p167_p2 = scmp.ne.s32.totalorder %s87_s27, %s166_s13  ;;  %s170_s14 = scalar_lea.vmem %s87_s27, 32 }
  0xec   :  { %v66_v17 = vsub.f32 %v62_v16, %v51_v15  ;;  %65 = vst.msk [vmem:[#allocation8] sm:$0x1] %vm63_vm0, %v62_v16  ;;  %p171_p3 = scmp.lt.s32.totalorder %s87_s27, %s87_s27  ;;  %p172_p4 = scmp.lt.s32.totalorder %s170_s14, %s166_s13 }
  0xee   :  { %p173_p5 = por %p172_p4, %p171_p3 }
  0xf0   :  { %p174_p6 = pnand %p173_p5, %p167_p2 }
  0xf2   :  { %177 = shalt.err (!%p174_p6)
}
  0xf3   :  { %s178_s17 = scalar_lea.hbm %s293_s2, 16 }
  0xf4   :  { %p179_p7 = scmp.ne.s32.totalorder %s293_s2, %s178_s17  ;;  %p182_p8 = scmp.lt.u32.totalorder %s178_s17, %s293_s2 }
  0xf6   :  { %p184_p9 = pnand %p182_p8, %p179_p7 }
  0xf8   :  { %187 = shalt.err (!%p184_p9)
}
  0xf9   :  { %89 = dma.vmem_to_hbm [thread:$0]  %s87_s27, 16, %s293_s2, [#allocation9]   ;;  %120 = vrcp.f32 %v66_v17 }
  0xfa   :  { %s219_s23 = smov [#allocation10]  }
  0xfb   :  { %s96_s0 = sshll.u32 %s219_s23, 4  ;;  %s97_s0 = int_to_ptr.vmem [resolvable:$true] %s96_s0 }
  0xfc   :  { %s188_s24 = scalar_lea.vmem %s97_s0, 16  ;;  %s192_s25 = scalar_lea.vmem %s97_s0, 32 }
  0xfd   :  { %p189_p10 = scmp.ne.s32.totalorder %s97_s0, %s188_s24  ;;  %p193_p11 = scmp.lt.s32.totalorder %s97_s0, %s97_s0 }
  0xfe   :  { %p194_p12 = scmp.lt.s32.totalorder %s192_s25, %s188_s24 }
 0x100   :  { %p195_p13 = por %p194_p12, %p193_p11 }
 0x102   :  { %p196_p0 = pnand %p195_p13, %p189_p10 }
 0x103   :  { %v121_v18 = vpop.eup %120 }
 0x104   :  { %69 = vst.msk [vmem:[#allocation10] sm:$0x1] %vm63_vm0, %v121_v18 }
 0x105   :  { %199 = shalt.err (!%p196_p0)
}
 0x106   :  { %s200_s29 = scalar_lea.hbm %s294_s3, 16 }
 0x107   :  { %p201_p1 = scmp.ne.s32.totalorder %s294_s3, %s200_s29  ;;  %p204_p2 = scmp.lt.u32.totalorder %s200_s29, %s294_s3 }
 0x109   :  { %p206_p3 = pnand %p204_p2, %p201_p1 }
 0x10b   :  { %209 = shalt.err (!%p206_p3)
}
 0x10c   :  { %99 = dma.vmem_to_hbm [thread:$0]  %s97_s0, 16, %s294_s3, [#allocation9]  }
 0x10d   :  { %212 = dma.done.wait [#allocation6], 16  }
 0x10e   :  { %213 = vsyncadd [#allocation6], 4294967280 }
 0x10f   :  { %214 = dma.done.wait [#allocation9], 32  }
 0x110   :  { %215 = vsyncadd [#allocation9], 4294967264 }
 0x111   :  { %109 = vsyncpa [#allocation5], 1 }
 0x112   :  { %110 = vsyncpa [#allocation6], 1 }
 0x113   :  { %111 = vsyncpa [#allocation9], 1 }

</bundles_post_ra>
